<compile_context>
chip_gen: v6e
topology: v6e:2x2x1
jax: 0.10.0
libtpu: 0.0.40
codegen_flags: <defaults>
</compile_context>

<pallas_src>
import functools

import jax
import jax.numpy as jnp
from jax import lax
from jax.experimental import pallas as pl
from jax.experimental.pallas import tpu as pltpu


def _resb_kernel(x_ref, w_ref, ids_ref, sh_ref, o_ref, col_ref, *, K, pad):
    """Fused eval-mode ResB block, channels-first layout.

    x_ref  : (1, C, L)   input block (f32); also provides the residual branch
    w_ref  : (C, K*C)    BN-folded conv weights (compute dtype, e.g. bf16)
    ids_ref: (C, 1)      identity scale  (= s2)
    sh_ref : (C, 1)      shift           (= s2*b1 + b2)
    o_ref  : (1, C, L)   output block
    col_ref: (K*C, L)    VMEM scratch holding the im2col of this block
    """
    x = x_ref[0]                      # (C, L) f32
    C, L = x.shape

    # Build im2col in VMEM: row band k holds x shifted by (k - pad) along L
    # with zero fill -> implements the 'same' zero padding in-register.
    for k in range(K):                # K static -> unrolled
        off = k - pad
        r0 = k * C
        if off < 0:
            p = -off
            col_ref[r0:r0 + C, :p] = jnp.zeros((C, p), col_ref.dtype)
            col_ref[r0:r0 + C, p:] = x[:, :L - p]
        elif off == 0:
            col_ref[r0:r0 + C, :] = x
        else:
            col_ref[r0:r0 + C, :L - off] = x[:, off:]
            col_ref[r0:r0 + C, L - off:] = jnp.zeros((C, off), col_ref.dtype)

    # One MXU matmul for all K taps: (C, K*C) @ (K*C, L) -> (C, L), f32 accum.
    acc = jnp.dot(w_ref[...], col_ref[...].astype(w_ref.dtype),
                  preferred_element_type=jnp.float32)

    # Folded BN1/BN2 + residual, then ReLU. Dropout: eval-mode identity (no-op).
    out = acc + ids_ref[...] * x + sh_ref[...]
    o_ref[0] = jnp.maximum(out, 0.0).astype(o_ref.dtype)


def fold_bn(gamma, beta, mean, var, eps=1e-5):
    s = gamma / jnp.sqrt(var + eps)
    b = beta - mean * s
    return s, b


def resb_forward(x_ncl, w, bn1, bn2, pad, *, compute_dtype=jnp.bfloat16):
    """Eval-mode ResB forward.

    x_ncl: (N, C, L) float32 (PyTorch Conv1d layout; kept as-is, no transposes)
    w    : (C_out, C_in, K)  Conv1d weight (bias=False)
    bn1/bn2: tuples (gamma, beta, running_mean, running_var)
    compute_dtype: dtype of the MXU operands (bf16 recommended; f32 for exactness)
    """
    N, C, L = x_ncl.shape
    C_out, C_in, K = w.shape
    assert C_out == C and C_in == C, "ResB uses num_filters->num_filters conv"
    assert L + 2 * pad - K + 1 == L, "residual add requires 'same' conv (pad=(K-1)//2)"

    s1, b1 = fold_bn(*bn1)
    s2, b2 = fold_bn(*bn2)
    # Fold BN1*BN2 scale into the conv weights; both BN shifts collapse to one affine:
    #   out = relu( (s1*s2)*conv(x) + s2*x + (s2*b1 + b2) )
    w_flat = (jnp.transpose(w, (0, 2, 1)).reshape(C, K * C)
              * (s1 * s2)[:, None]).astype(compute_dtype)            # (C_out, K*C_in)
    id_scale = s2.reshape(C, 1).astype(jnp.float32)
    shift = (s2 * b1 + b2).reshape(C, 1).astype(jnp.float32)

    kernel = functools.partial(_resb_kernel, K=K, pad=pad)

    return pl.pallas_call(
        kernel,
        out_shape=jax.ShapeDtypeStruct((N, C, L), x_ncl.dtype),
        grid_spec=pltpu.PrefetchScalarGridSpec(
            num_scalar_prefetch=0,
            grid=(N,),
            in_specs=[
                pl.BlockSpec((1, C, L), lambda n: (n, 0, 0)),     # x (conv + residual)
                pl.BlockSpec((C, K * C), lambda n: (0, 0)),       # folded weights (resident)
                pl.BlockSpec((C, 1), lambda n: (0, 0)),           # identity scale (s2)
                pl.BlockSpec((C, 1), lambda n: (0, 0)),           # shift (s2*b1 + b2)
            ],
            out_specs=pl.BlockSpec((1, C, L), lambda n: (n, 0, 0)),
            scratch_shapes=[pltpu.VMEM((K * C, L), jnp.float32)],  # im2col scratch
        ),
        compiler_params=pltpu.CompilerParams(dimension_semantics=("parallel",)),
    )(x_ncl, w_flat, id_scale, shift)


def resb_reference(x_ncl, w, bn1, bn2, pad, *, compute_dtype=jnp.bfloat16):
    """Pure-JAX reference with the SAME operand rounding as the kernel
    (folded weights / conv input rounded to compute_dtype, f32 accumulation)."""
    s1, b1 = fold_bn(*bn1)
    s2, b2 = fold_bn(*bn2)
    w_folded = (w * (s1 * s2)[:, None, None]).astype(compute_dtype).astype(jnp.float32)
    xq = x_ncl.astype(compute_dtype).astype(jnp.float32)
    y = lax.conv_general_dilated(
        xq, w_folded, window_strides=(1,), padding=[(pad, pad)],
        dimension_numbers=("NCH", "OIH", "NCH"),
        precision=lax.Precision.HIGHEST)
    y = y + s2[None, :, None] * x_ncl + (s2 * b1 + b2)[None, :, None]
    return jnp.maximum(y, 0.0)


def resb_reference_f32(x_ncl, w, bn1, bn2, pad):
    """Pure-f32 eval-mode ResB (exact module semantics) for a sanity check."""
    y = lax.conv_general_dilated(
        x_ncl, w, window_strides=(1,), padding=[(pad, pad)],
        dimension_numbers=("NCH", "OIH", "NCH"),
        precision=lax.Precision.HIGHEST)
    s1, b1 = fold_bn(*bn1)
    s2, b2 = fold_bn(*bn2)
    y = y * s1[None, :, None] + b1[None, :, None] + x_ncl
    y = y * s2[None, :, None] + b2[None, :, None]
    return jnp.maximum(y, 0.0)


if __name__ == "__main__":
    N, C, L = 2, 4, 16          # batch, num_filters, sequence length
    K, PAD = 3, 1               # kernel=3, pad=1 ("same" conv so residual add works)

    key = jax.random.PRNGKey(0)
    keys = jax.random.split(key, 10)

    x = jax.random.normal(keys[0], (N, C, L), dtype=jnp.float32)
    w = jax.random.normal(keys[1], (C, C, K), dtype=jnp.float32) * 0.2

    bn1 = (
        jax.random.uniform(keys[2], (C,), minval=0.5, maxval=1.5),   # gamma
        jax.random.normal(keys[3], (C,)) * 0.1,                      # beta
        jax.random.normal(keys[4], (C,)) * 0.1,                      # running_mean
        jax.random.uniform(keys[5], (C,), minval=0.5, maxval=1.5),   # running_var
    )
    bn2 = (
        jax.random.uniform(keys[6], (C,), minval=0.5, maxval=1.5),
        jax.random.normal(keys[7], (C,)) * 0.1,
        jax.random.normal(keys[8], (C,)) * 0.1,
        jax.random.uniform(keys[9], (C,), minval=0.5, maxval=1.5),
    )

    out = resb_forward(x, w, bn1, bn2, PAD)
    out = jax.block_until_ready(out)
    assert out.shape == (N, C, L)

    # Tight check vs a reference that uses identical bf16 operand rounding.
    ref = resb_reference(x, w, bn1, bn2, PAD)
    assert jnp.allclose(out, ref, atol=1e-4, rtol=1e-4), "mismatch vs bf16-consistent reference"

    # Loose sanity check vs exact f32 module semantics (bf16 rounding tolerance).
    ref32 = resb_reference_f32(x, w, bn1, bn2, PAD)
    assert jnp.allclose(out, ref32, atol=1e-1, rtol=1e-1), "mismatch vs f32 reference"

    print("KERNEL_OK")
</pallas_src>

<mosaic_0001>
module attributes {stable_mosaic.version = 11 : i64} {
  func.func @_resb_kernel(%arg0: i32, %arg1: memref<1x4x16xf32, #tpu.memory_space<vmem>>, %arg2: memref<4x12xbf16, #tpu.memory_space<vmem>>, %arg3: memref<4x1xf32, #tpu.memory_space<vmem>>, %arg4: memref<4x1xf32, #tpu.memory_space<vmem>>, %arg5: memref<1x4x16xf32, #tpu.memory_space<vmem>>, %arg6: memref<12x16xf32, #tpu.memory_space<vmem>>) attributes {dimension_semantics = [#tpu.dimension_semantics<parallel>], iteration_bounds = array<i64: 2>, scalar_prefetch = 0 : i64, scratch_operands = 1 : i64, tpu.core_type = #tpu.core_type<tc>, window_params = [{transform_indices = @transform_0, window_bounds = array<i64: 1, 4, 16>}, {pipeline_mode = #tpu.pipeline_mode<synchronous>, transform_indices = @transform_1, window_bounds = array<i64: 4, 12>}, {pipeline_mode = #tpu.pipeline_mode<synchronous>, transform_indices = @transform_2, window_bounds = array<i64: 4, 1>}, {pipeline_mode = #tpu.pipeline_mode<synchronous>, transform_indices = @transform_3, window_bounds = array<i64: 4, 1>}, {transform_indices = @transform_4, window_bounds = array<i64: 1, 4, 16>}]} {
    %c0 = arith.constant 0 : index
    %c0_0 = arith.constant 0 : index
    %c0_1 = arith.constant 0 : index
    %0 = vector.load %arg1[%c0, %c0_0, %c0_1] : memref<1x4x16xf32, #tpu.memory_space<vmem>>, vector<1x4x16xf32>
    %1 = vector.shape_cast %0 : vector<1x4x16xf32> to vector<4x16xf32>
    %cst = arith.constant 0.000000e+00 : f32
    %2 = vector.broadcast %cst : f32 to vector<4x1xf32>
    %c0_2 = arith.constant 0 : index
    %c0_3 = arith.constant 0 : index
    %3 = vector.load %arg6[%c0_2, %c0_3] : memref<12x16xf32, #tpu.memory_space<vmem>>, vector<4x1xf32>
    tpu.vector_store %arg6[%c0_2, %c0_3], %2 {strides = array<i32>} : memref<12x16xf32, #tpu.memory_space<vmem>>, vector<4x1xf32>,
    %4 = vector.extract_strided_slice %1 {offsets = [0, 0], sizes = [4, 15], strides = [1, 1]} : vector<4x16xf32> to vector<4x15xf32>
    %c0_4 = arith.constant 0 : index
    %c1 = arith.constant 1 : index
    %5 = vector.load %arg6[%c0_4, %c1] : memref<12x16xf32, #tpu.memory_space<vmem>>, vector<4x15xf32>
    tpu.vector_store %arg6[%c0_4, %c1], %4 {strides = array<i32>} : memref<12x16xf32, #tpu.memory_space<vmem>>, vector<4x15xf32>,
    %c4 = arith.constant 4 : index
    %c0_5 = arith.constant 0 : index
    %6 = vector.load %arg6[%c4, %c0_5] : memref<12x16xf32, #tpu.memory_space<vmem>>, vector<4x16xf32>
    tpu.vector_store %arg6[%c4, %c0_5], %1 {strides = array<i32>} : memref<12x16xf32, #tpu.memory_space<vmem>>, vector<4x16xf32>,
    %7 = vector.extract_strided_slice %1 {offsets = [0, 1], sizes = [4, 15], strides = [1, 1]} : vector<4x16xf32> to vector<4x15xf32>
    %c8 = arith.constant 8 : index
    %c0_6 = arith.constant 0 : index
    %8 = vector.load %arg6[%c8, %c0_6] : memref<12x16xf32, #tpu.memory_space<vmem>>, vector<4x15xf32>
    tpu.vector_store %arg6[%c8, %c0_6], %7 {strides = array<i32>} : memref<12x16xf32, #tpu.memory_space<vmem>>, vector<4x15xf32>,
    %cst_7 = arith.constant 0.000000e+00 : f32
    %9 = vector.broadcast %cst_7 : f32 to vector<4x1xf32>
    %c8_8 = arith.constant 8 : index
    %c15 = arith.constant 15 : index
    %10 = vector.load %arg6[%c8_8, %c15] : memref<12x16xf32, #tpu.memory_space<vmem>>, vector<4x1xf32>
    tpu.vector_store %arg6[%c8_8, %c15], %9 {strides = array<i32>} : memref<12x16xf32, #tpu.memory_space<vmem>>, vector<4x1xf32>,
    %c0_9 = arith.constant 0 : index
    %c0_10 = arith.constant 0 : index
    %11 = vector.load %arg2[%c0_9, %c0_10] : memref<4x12xbf16, #tpu.memory_space<vmem>>, vector<4x12xbf16>
    %c0_11 = arith.constant 0 : index
    %c0_12 = arith.constant 0 : index
    %12 = vector.load %arg6[%c0_11, %c0_12] : memref<12x16xf32, #tpu.memory_space<vmem>>, vector<12x16xf32>
    %13 = arith.truncf %12 : vector<12x16xf32> to vector<12x16xbf16>
    %cst_13 = arith.constant dense<0.000000e+00> : vector<4x16xf32>
    %14 = tpu.matmul %11, %13, %cst_13 {dimension_numbers = #tpu.dot_dimension_numbers<[1], [0], [0], [1], [0, 0, 1, 1], [], []>} : vector<4x12xbf16>, vector<12x16xbf16>, vector<4x16xf32> -> vector<4x16xf32>
    %c0_14 = arith.constant 0 : index
    %c0_15 = arith.constant 0 : index
    %15 = vector.load %arg3[%c0_14, %c0_15] : memref<4x1xf32, #tpu.memory_space<vmem>>, vector<4x1xf32>
    %16 = vector.broadcast %15 : vector<4x1xf32> to vector<4x16xf32>
    %17 = arith.mulf %16, %1 : vector<4x16xf32>
    %18 = arith.addf %14, %17 : vector<4x16xf32>
    %c0_16 = arith.constant 0 : index
    %c0_17 = arith.constant 0 : index
    %19 = vector.load %arg4[%c0_16, %c0_17] : memref<4x1xf32, #tpu.memory_space<vmem>>, vector<4x1xf32>
    %20 = vector.broadcast %19 : vector<4x1xf32> to vector<4x16xf32>
    %21 = arith.addf %18, %20 : vector<4x16xf32>
    %cst_18 = arith.constant 0.000000e+00 : f32
    %22 = vector.broadcast %cst_18 : f32 to vector<4x16xf32>
    %23 = arith.maximumf %21, %22 : vector<4x16xf32>
    %c0_19 = arith.constant 0 : index
    %c0_20 = arith.constant 0 : index
    %c0_21 = arith.constant 0 : index
    %24 = vector.load %arg5[%c0_19, %c0_20, %c0_21] : memref<1x4x16xf32, #tpu.memory_space<vmem>>, vector<1x4x16xf32>
    %25 = vector.shape_cast %24 : vector<1x4x16xf32> to vector<4x16xf32>
    %26 = vector.shape_cast %23 : vector<4x16xf32> to vector<1x4x16xf32>
    tpu.vector_store %arg5[%c0_19, %c0_20, %c0_21], %26 {strides = array<i32>} : memref<1x4x16xf32, #tpu.memory_space<vmem>>, vector<1x4x16xf32>,
    return
  }
  func.func @transform_0(%arg0: i32) -> (i32, i32, i32) {
    %c0_i32 = arith.constant 0 : i32
    %c0_i32_0 = arith.constant 0 : i32
    %c0_i32_1 = arith.constant 0 : i32
    return %arg0, %c0_i32, %c0_i32_0 : i32, i32, i32
  }
  func.func @transform_1(%arg0: i32) -> (i32, i32) {
    %c0_i32 = arith.constant 0 : i32
    %c0_i32_0 = arith.constant 0 : i32
    %c0_i32_1 = arith.constant 0 : i32
    return %c0_i32, %c0_i32_0 : i32, i32
  }
  func.func @transform_2(%arg0: i32) -> (i32, i32) {
    %c0_i32 = arith.constant 0 : i32
    %c0_i32_0 = arith.constant 0 : i32
    %c0_i32_1 = arith.constant 0 : i32
    return %c0_i32, %c0_i32_0 : i32, i32
  }
  func.func @transform_3(%arg0: i32) -> (i32, i32) {
    %c0_i32 = arith.constant 0 : i32
    %c0_i32_0 = arith.constant 0 : i32
    %c0_i32_1 = arith.constant 0 : i32
    return %c0_i32, %c0_i32_0 : i32, i32
  }
  func.func @transform_4(%arg0: i32) -> (i32, i32, i32) {
    %c0_i32 = arith.constant 0 : i32
    %c0_i32_0 = arith.constant 0 : i32
    %c0_i32_1 = arith.constant 0 : i32
    return %arg0, %c0_i32, %c0_i32_0 : i32, i32, i32
  }
}

</mosaic_0001>

<bundles_post_ra>
// kernel: tpu_custom_call.1
= control target key start
LH: loop header
LB: loop body
LE: loop exit
PB: predicated region body
PF: predicated region fallthrough
CT: control target
= control target key end

     0   :  { %9 = vsyncpa [#allocation4], 0  ;;  %s615_s0 = inlined_call_operand.vmem [shape: f32[2,4,16], index: 0, kind: input, shape index: {}]   ;;  %s616_s1 = inlined_call_operand.vmem [shape: bf16[4,12], index: 1, kind: input, shape index: {}]   ;;  %s617_s2 = inlined_call_operand.vmem [shape: f32[4,1], index: 2, kind: input, shape index: {}]   ;;  %s618_s3 = inlined_call_operand.vmem [shape: f32[4,1], index: 3, kind: input, shape index: {}]   ;;  %s619_s4 = inlined_call_operand.hbm [shape: f32[2,4,16], index: 4, kind: output, shape index: {}]  }
   0x1   :  { %11 = vsyncpa [#allocation4 + $0x1], 0  ;;  %s511_s15 = smov 0   ;;  %s513_s16 = smov 0  }
   0x2   :  { %s515_s17 = smov 0   ;;  %s517_s18 = smov 0  }
   0x3 LB: > { %s532_s19 = sadd.s32 4294967295, %s478_s18   ;;  %s353_s20 = sadd.s32 4294967294, %s478_s18   ;;  %s478_s18 = sphi %s517_s18, %s625_s18   ;;  %s474_s17 = sphi %s515_s17, %s624_s17   ;;  %s470_s16 = sphi %s513_s16, %s623_s16   ;;  %s466_s15 = sphi %s511_s15, %s622_s15  }
   0x4   : > { %s536_s21 = sadd.s32 1, %s478_s18   ;;  %s113_s22 = sadd.s32 1, %s474_s17 }
   0x5   : > { %s110_s23 = ssub.s32 %s478_s18, %s536_s21  ;;  %p123_p0 = scmp.ne.s32.totalorder %s474_s17, %s470_s16 }
   0x6   : > { %p111_p1 = scmp.eq.s32.totalorder %s110_s23, 0  ;;  %p124_p2 = scmp.eq.s32.totalorder %s532_s19, 1 }
   0x7   : > { %p129_p3 = scmp.ne.s32.totalorder %s470_s16, %s466_s15  ;;  %p130_p4 = scmp.eq.s32.totalorder %s353_s20, 1 }
   0x8   : > { %s547_s24 = scalar_select %p111_p1, %s474_s17, %s113_s22  }
   0x9   : > { %p549_p5 = por %p124_p2, %p123_p0  ;;  %p553_p6 = por %p130_p4, %p129_p3 }
   0xa   : > { %p356_p7 = scmp.ge.s32.totalorder %s478_s18, 1  ;;  %p164_p8 = scmp.lt.s32.totalorder %s478_s18, 3 }
   0xc   : > { %p165_p9 = pnand %p356_p7, %p164_p8 }
   0xd   : > { %p189_p10 = scmp.lt.s32.totalorder (!%p165_p9), %s532_s19, 1  ;;  %s481_s6 = smov (!%p165_p9), 127  }
   0xe   : > { %168 = sbr.rel (%p165_p9) target bundleno = 369 (0x171), region = 36  ;;  %s483_s7 = smov (!%p165_p9), 1  }
   0xf   : > { %s186_s14 = sand.u32 (!%p165_p9), 1, %s470_s16   ;;  %s361_s22 = sshll.u32 (!%p165_p9), %s532_s19, 6 }
  0x10   : > { %s357_s20 = sshll.u32 (!%p165_p9), %s186_s14, 2  ;;  %s579_s30 = scalar_lea.hbm (!%p165_p9), %s619_s4, %s361_s22 }
  0x11   : > { %s188_s23 = scalar_lea.vmem (!%p165_p9), [#allocation3], %s357_s20 }
  0x13   : > { %vm195_vm0 = vcmask 3072   ;;  %v480_v0 = vmov 0.0   ;;  %s190_s27 = scalar_select %p189_p10, %s532_s19, 1  ;;  %vm203_vm1 = vcmask 125952   ;;  %vm482_vm2 = vmmov 0  }
  0x14   : > { %366 = vmatprep.subr.bf16.mxu0 %v480_v0  ;;  %196 = vst.msk [vmem:[#allocation2] sm:$0xf] %vm195_vm0, %v480_v0  ;;  %368 = vmatprep.mubr.msk.bf16.mxu0 %vm482_vm2, %v480_v0  ;;  %v216_v2 = vld [vmem:[%s617_s2] sm:$0xf]  ;;  %v484_v3 = vmov 0   ;;  %vm208_vm3 = vcmask 117760  }
  0x15   : > { %s358_s28 = sshll.u32 %s190_s27, 2  ;;  %416 = vset.pattern.permute.xlu1 %v484_v3  ;;  %417 = vset.pattern.permute.xlu0 %v484_v3  ;;  %v271_v4 = vld [vmem:[%s618_s3] sm:$0xf]  ;;  %vm210_vm4 = vcmask 126072   ;;  %vm201_vm5 = vcmask 125960   ;;  %vm227_vm6 = vcmask 1045504  }
  0x16   : > { %s192_s5 = scalar_lea.vmem %s615_s0, %s358_s28  ;;  %219 = vperm.xlu1 %416, %v216_v2   ;;  %v212_v11 = vld [vmem:[%s616_s1] sm:$0x3]  ;;  %vm223_vm7 = vcmask 97280   ;;  %s294_s27 = sshll.u32 %s188_s23, 4  ;;  %s295_s27 = int_to_ptr.vmem [resolvable:$true] %s294_s27 }
  0x17   : > { %v194_v1 = vld [vmem:[%s192_s5] sm:$0xf]  ;;  %s281_s5 = scalar_lea.sflag [#allocation4], %s186_s14  ;;  %s485_s19 = smov [#allocation3]  }
  0x18   : > { %205 = vrot.lane.b32.xlu0 %v194_v1, %s481_s6  ;;  %204 = vst.msk [vmem:[#allocation2 + $0x4] sm:$0xf] %vm203_vm1, %v194_v1  ;;  %s418_s6 = scalar_lea.vmem %s295_s27, 64 }
  0x19   : > { %p419_p11 = scmp.ne.s32.totalorder %s295_s27, %s418_s6 }
  0x1a   : > { %274 = vperm.xlu1 %416, %v271_v4  }
  0x1b   : > { %p420_p12 = pnand %p419_p11, %p549_p5 }
  0x1c   : > { %198 = vrot.lane.b32.xlu0 %v194_v1, %s483_s7  ;;  %s422_s7 = sshll.u32 %s485_s19, 4  ;;  %s423_s7 = int_to_ptr.vmem [resolvable:$false] %s422_s7 }
  0x1d   : > { %p421_p13 = pneg %p420_p12  ;;  %s424_s8 = scalar_lea.vmem %s423_s7, 128 }
  0x1e   : > { %p425_p0 = scmp.lt.s32.totalorder %s295_s27, %s423_s7  ;;  %p426_p1 = scmp.lt.s32.totalorder %s424_s8, %s418_s6 }
  0x20   : > { %p427_p2 = por %p426_p1, %p425_p0 }
  0x22   : > { %p428_p3 = pnand %p427_p2, %p421_p13 }
  0x8a   : > { %v206_v5 = vpop.permute.xlu0 %205 }
  0x8b   : > { %209 = vst.msk [vmem:[#allocation2 + $0x8] sm:$0xf] %vm208_vm3, %v206_v5 }
  0x8c   : > { %211 = vst.msk [vmem:[#allocation2 + $0x8] sm:$0xf] %vm210_vm4, %v480_v0 }
  0x8e   : > { %v199_v6 = vpop.permute.xlu0 %198 }
  0x8f   : > { %202 = vst.msk [vmem:[#allocation2] sm:$0xf] %vm201_vm5, %v199_v6 }
  0x91   : > { %v220_v12 = vpop.permute.xlu1 %219 }
  0x92   : > { %v222_v13 = vmul.f32 %v220_v12, %v194_v1 }
  0x93   : > { %v214_v7 = vld [vmem:[#allocation2 + $0x8] sm:$0xf] }
  0x95   : > { %v275_v16 = vpop.permute.xlu1 %274 }
  0x96   : > { %v213_v8 = vld [vmem:[#allocation2] sm:$0xff] }
  0x97   : > { %v215_v9 = vpack.c.bf16 %v214_v7, %v213_v8 }
  0x99   : > { %v229_v10 = vsel %vm227_vm6, %v215_v9, 0 }
  0x9a   : > { %367 = vmatpush3.bf16.msra.mxu0 %v229_v10 }
  0x9d   : > { %369 = vmatmul.mubr.msk.bf16.vlgmr.msra.gmra.mxu0 %vm223_vm7, %v212_v11 }
 0x15d   : > { %v265_v14 = vpop.f32.mrf.mxu0 }
 0x15e   : > { %v266_v15 = vadd.f32 %v265_v14, %v222_v13 }
 0x15f   : > { %v370_v17 = vpop.f32.mrf.mxu0 }
 0x160   : > { %v277_v18 = vadd.f32 %v275_v16, %v266_v15 }
 0x161   : > { %v268_v19 = vpop.f32.mrf.mxu0 }
 0x162   : > { %v278_v20 = vmax.f32 %v277_v18, 0.0 }
 0x163   : > { %v371_v21 = vpop.f32.mrf.mxu0 }
 0x164   : > { %279 = vst.msk [vmem:[%s188_s23] sm:$0xf] %vm203_vm1, %v278_v20 }
 0x165   : > { %431 = shalt.err (!%p428_p3)
}
 0x166   : > { %s432_s9 = scalar_lea.hbm %s579_s30, 64  ;;  %s436_s12 = scalar_lea.hbm %s619_s4, 128 }
 0x167   : > { %p433_p4 = scmp.ne.s32.totalorder %s579_s30, %s432_s9  ;;  %p437_p9 = scmp.lt.s32.totalorder %s579_s30, %s619_s4 }
 0x168   : > { %p438_p10 = scmp.lt.s32.totalorder %s436_s12, %s432_s9 }
 0x169   : > { %p434_p7 = pnand %p433_p4, %p549_p5 }
 0x16a   : > { %p439_p11 = por %p438_p10, %p437_p9 }
 0x16b   : > { %p435_p8 = pneg %p434_p7 }
 0x16d   : > { %p440_p12 = pnand %p439_p11, %p435_p8 }
 0x16f   : > { %443 = shalt.err (!%p440_p12)
}
 0x170   : > { %372 = dma.vmem_to_hbm [thread:$0]  (%p549_p5), %s295_s27, 64, %s579_s30, %s281_s5  }
 0x171 PF: > { %p378_p13 = scmp.ge.s32.totalorder %s478_s18, 2  ;;  %s306_s20 = sand.u32 1, %s466_s15  }
 0x172   : > { %s307_s22 = scalar_lea.sflag [#allocation4], %s306_s20 }
 0x173   : > { %p375_p0 = pnand %p378_p13, %p553_p6 }
 0x175   : > { %p376_p1 = pneg %p375_p0 }
 0x177   : > { %461 = dma.done.wait (%p376_p1), %s307_s22, 64  }
 0x178   : > { %463 = vsyncadd (%p376_p1), %s307_s22, 4294967232  ;;  %p14_p2 = scmp.ge.s32.totalorder %s536_s21, 4   ;;  %s622_s15 = smov %s470_s16 }
 0x179   : > { %s623_s16 = smov %s474_s17  ;;  %s624_s17 = smov %s547_s24 }
 0x17a   : > { %s625_s18 = smov %s536_s21  ;;  %16 = sbr.rel (!%p14_p2) target bundleno = 3 (0x3), region = 71 }
 0x17f   :  { %312 = vsyncpa [#allocation4], 1 }
 0x180   :  { %314 = vsyncpa [#allocation4 + $0x1], 1 }

</bundles_post_ra>
